<compile_context>
chip_gen: v6e
topology: v6e:2x2x1
jax: 0.10.0
libtpu: 0.0.40
codegen_flags: <defaults>
</compile_context>

<pallas_src>
import functools

import jax
import jax.numpy as jnp
from jax.experimental import pallas as pl
from jax.experimental.pallas import tpu as pltpu


def _clip_kernel(x_ref, o_ref, *, min_val, max_val):
    # Elementwise clamp on the whole VMEM tile (VPU work, max bound applied
    # last to match torch.clamp's min->max ordering & NaN propagation).
    x = x_ref[...]
    lo = jnp.asarray(min_val, x.dtype)
    hi = jnp.asarray(max_val, x.dtype)
    o_ref[...] = jnp.minimum(jnp.maximum(x, lo), hi)


def _default_vmem_limit_bytes():
    # Half of physical VMEM (32 MiB on v7x, 64 MiB on v5e/v6e), queried when
    # possible; safe fixed default otherwise.
    try:
        cap = pltpu.get_tpu_info().vmem_capacity_bytes
        return int(min(cap // 2, 64 * 1024 * 1024))
    except Exception:
        return 32 * 1024 * 1024


def clip_pallas(img, min_val=0.0, max_val=1.0, *,
                in_place=False,
                target_tile_bytes=2 * 1024 * 1024,
                vmem_limit_bytes=None,
                min_bytes_for_kernel=1 * 1024 * 1024):
    """Pallas equivalent of torch.clip(img, min_val, max_val) for NCHW input.

    Args:
      in_place: opt-in input/output aliasing.  Only enable when `img` is dead
        after this call (e.g. a donated jit argument); otherwise XLA inserts a
        defensive full copy that doubles HBM traffic.
      min_bytes_for_kernel: below this size the plain XLA clip is used (kernel
        launch/pipeline overhead dominates tiny tensors).
    """
    # TODO(synk): integer dtypes truncate fractional min/max bounds when cast
    # to the input dtype (torch.clip would promote/error instead).
    orig_shape = img.shape
    dtype = img.dtype
    n = img.size
    if n == 0:
        return img

    itemsize = jnp.dtype(dtype).itemsize

    # Small-input bailout: XLA's fused elementwise clip is strictly cheaper.
    if n * itemsize < min_bytes_for_kernel:
        lo = jnp.asarray(min_val, dtype)
        hi = jnp.asarray(max_val, dtype)
        return jnp.minimum(jnp.maximum(img, lo), hi)

    # Fast path only: find a large, lane-dense column count (multiple of 128)
    # that exactly divides the element count -> reshape is free, no padding.
    cols = 0
    for c in (8192, 4096, 2048, 1024, 512, 256, 128):
        if n % c == 0:
            cols = c
            break

    if not cols:
        # Ragged shape: do NOT pad+slice (2 extra HBM passes) — XLA's fused
        # clip is already at HBM roofline for this memory-bound op.
        lo = jnp.asarray(min_val, dtype)
        hi = jnp.asarray(max_val, dtype)
        return jnp.minimum(jnp.maximum(img, lo), hi)

    x2d = img.reshape(n // cols, cols)
    rows = x2d.shape[0]

    # Native sublane packing: 8 rows for 32-bit, 16 for 16-bit, 32 for 8-bit.
    sub = max(8, 32 // itemsize)

    # Tile rows: biggest multiple of `sub` whose tile fits target_tile_bytes
    # (double-buffered in + out ~= 4x this much VMEM), clamped to the array,
    # and capped so the grid has >= 2 steps whenever possible so both v7x
    # TensorCores can stream (harmless on single-TC v5e/v6e).
    if rows <= sub:
        tile_rows = rows  # block dim == full array dim -> (8,128) rule waived
    else:
        by_bytes = max(sub, (target_tile_bytes // (cols * itemsize)) // sub * sub)
        tile_rows = int(min(by_bytes, (rows // sub) * sub))
        half = (rows // (2 * sub)) * sub
        if half >= sub:
            tile_rows = min(tile_rows, half)

    grid = (pl.cdiv(rows, tile_rows),)

    if vmem_limit_bytes is None:
        vmem_limit_bytes = _default_vmem_limit_bytes()

    kernel = functools.partial(_clip_kernel, min_val=min_val, max_val=max_val)

    out2d = pl.pallas_call(
        kernel,
        out_shape=jax.ShapeDtypeStruct((rows, cols), dtype),
        grid_spec=pl.GridSpec(
            grid=grid,
            in_specs=[pl.BlockSpec((tile_rows, cols), lambda i: (i, 0))],
            out_specs=pl.BlockSpec((tile_rows, cols), lambda i: (i, 0)),
        ),
        input_output_aliases={0: 0} if in_place else {},
        cost_estimate=pl.CostEstimate(
            flops=2 * n, transcendentals=0, bytes_accessed=2 * n * itemsize),
        compiler_params=pltpu.CompilerParams(
            dimension_semantics=("parallel",),
            vmem_limit_bytes=vmem_limit_bytes),
    )(x2d)

    return out2d.reshape(orig_shape)


if __name__ == "__main__":
    key = jax.random.PRNGKey(0)

    # Small NCHW input consistent with image-style usage of Clip.
    x_small = jax.random.normal(key, (2, 4, 16, 16), dtype=jnp.float32) * 2.0
    ref_small = jnp.clip(x_small, 0.0, 1.0)

    # Default path: tiny tensor takes the XLA-clip bailout.
    out_bail = jax.block_until_ready(clip_pallas(x_small, 0.0, 1.0))
    assert out_bail.shape == x_small.shape and out_bail.dtype == x_small.dtype
    assert jnp.allclose(out_bail, ref_small), "bailout path mismatch"

    # Force the Pallas kernel on the same small tensor (single block).
    out_small = jax.block_until_ready(
        clip_pallas(x_small, 0.0, 1.0, min_bytes_for_kernel=0))
    assert out_small.shape == x_small.shape and out_small.dtype == x_small.dtype
    assert jnp.allclose(out_small, ref_small), "kernel path mismatch (small)"

    # Slightly larger image so the kernel runs a multi-step (megacore-capable)
    # grid; still a modest 512 KiB tensor.
    key2 = jax.random.PRNGKey(0)
    x_med = jax.random.normal(key2, (2, 4, 128, 128), dtype=jnp.float32) * 2.0
    ref_med = jnp.clip(x_med, 0.0, 1.0)
    out_med = jax.block_until_ready(
        clip_pallas(x_med, 0.0, 1.0, min_bytes_for_kernel=0))
    assert out_med.shape == x_med.shape and out_med.dtype == x_med.dtype
    assert jnp.allclose(out_med, ref_med), "kernel path mismatch (medium)"

    print("KERNEL_OK")
</pallas_src>

<mosaic_0001>
module attributes {stable_mosaic.version = 11 : i64} {
  func.func @_clip_kernel(%arg0: i32, %arg1: memref<1x2048xf32, #tpu.memory_space<vmem>>, %arg2: memref<1x2048xf32, #tpu.memory_space<vmem>>) attributes {dimension_semantics = [#tpu.dimension_semantics<parallel>], iteration_bounds = array<i64: 1>, scalar_prefetch = 0 : i64, scratch_operands = 0 : i64, tpu.core_type = #tpu.core_type<tc>, window_params = [{transform_indices = @transform_0, window_bounds = array<i64: 1, 2048>}, {transform_indices = @transform_1, window_bounds = array<i64: 1, 2048>}]} {
    %c0 = arith.constant 0 : index
    %c0_0 = arith.constant 0 : index
    %0 = vector.load %arg1[%c0, %c0_0] : memref<1x2048xf32, #tpu.memory_space<vmem>>, vector<1x2048xf32>
    %cst = arith.constant 0.000000e+00 : f32
    %1 = vector.broadcast %cst : f32 to vector<1x2048xf32>
    %2 = arith.maximumf %0, %1 : vector<1x2048xf32>
    %cst_1 = arith.constant 1.000000e+00 : f32
    %3 = vector.broadcast %cst_1 : f32 to vector<1x2048xf32>
    %4 = arith.minimumf %2, %3 : vector<1x2048xf32>
    %c0_2 = arith.constant 0 : index
    %c0_3 = arith.constant 0 : index
    %5 = vector.load %arg2[%c0_2, %c0_3] : memref<1x2048xf32, #tpu.memory_space<vmem>>, vector<1x2048xf32>
    tpu.vector_store %arg2[%c0_2, %c0_3], %4 {strides = array<i32>} : memref<1x2048xf32, #tpu.memory_space<vmem>>, vector<1x2048xf32>,
    return
  }
  func.func @transform_0(%arg0: i32) -> (i32, i32) {
    %c0_i32 = arith.constant 0 : i32
    %c0_i32_0 = arith.constant 0 : i32
    return %arg0, %c0_i32 : i32, i32
  }
  func.func @transform_1(%arg0: i32) -> (i32, i32) {
    %c0_i32 = arith.constant 0 : i32
    %c0_i32_0 = arith.constant 0 : i32
    return %arg0, %c0_i32 : i32, i32
  }
}

</mosaic_0001>

<bundles_post_ra>
// kernel: tpu_custom_call.1
= control target key start
LH: loop header
LB: loop body
LE: loop exit
PB: predicated region body
PF: predicated region fallthrough
CT: control target
= control target key end

     0   :  { %6 = vsyncpa [#allocation3], 0  ;;  %s108_s0 = inlined_call_operand.hbm [shape: f32[1,2048], index: 0, kind: input, shape index: {}]   ;;  %s109_s1 = inlined_call_operand.hbm [shape: f32[1,2048], index: 1, kind: output, shape index: {}]  }
   0x1   :  { %7 = vsyncpa [#allocation4], 0  ;;  %s90_s6 = smov [#allocation2]  }
   0x2   :  { %s14_s7 = sshll.u32 %s90_s6, 4  ;;  %s15_s7 = int_to_ptr.vmem [resolvable:$true] %s14_s7 }
   0x3   :  { %s54_s8 = scalar_lea.vmem %s15_s7, 256  ;;  %p59_p1 = scmp.lt.s32.totalorder %s15_s7, %s15_s7 }
   0x4   :  { %p55_p0 = scmp.ne.s32.totalorder %s15_s7, %s54_s8  ;;  %p60_p2 = scmp.lt.s32.totalorder %s54_s8, %s54_s8 }
   0x6   :  { %p61_p3 = por %p60_p2, %p59_p1 }
   0x8   :  { %p62_p4 = pnand %p61_p3, %p55_p0 }
   0xa   :  { %65 = shalt.err (!%p62_p4)
}
   0xb   :  { %17 = dma.hbm_to_vmem [thread:$0]  %s108_s0, 256, %s15_s7, [#allocation3]  }
   0xc   :  { %86 = dma.done.wait [#allocation3], 256  }
   0xd   :  { %87 = vsyncadd [#allocation3], 4294967040  ;;  %v21_v0 = vld [vmem:[#allocation2] sm:$0xff]  ;;  %v22_v1 = vld [vmem:[#allocation2 + $0x8] sm:$0xff]  ;;  %s91_s11 = smov [#allocation5]  }
   0xe   :  { %s35_s12 = sshll.u32 %s91_s11, 4  ;;  %v23_v2 = vmax.f32 %v21_v0, 0.0  ;;  %v24_v3 = vmax.f32 %v22_v1, 0.0  ;;  %s36_s12 = int_to_ptr.vmem [resolvable:$true] %s35_s12 }
   0xf   :  { %s66_s13 = scalar_lea.vmem %s36_s12, 256  ;;  %p71_p6 = scmp.lt.s32.totalorder %s36_s12, %s36_s12 }
  0x10   :  { %v25_v4 = vmin.f32 %v23_v2, 1.0  ;;  %v26_v5 = vmin.f32 %v24_v3, 1.0  ;;  %p67_p5 = scmp.ne.s32.totalorder %s36_s12, %s66_s13  ;;  %p72_p7 = scmp.lt.s32.totalorder %s66_s13, %s66_s13 }
  0x12   :  { %27 = vst [vmem:[#allocation5] sm:$0xff] %v25_v4  ;;  %28 = vst [vmem:[#allocation5 + $0x8] sm:$0xff] %v26_v5  ;;  %p73_p8 = por %p72_p7, %p71_p6 }
  0x14   :  { %p74_p9 = pnand %p73_p8, %p67_p5 }
  0x16   :  { %77 = shalt.err (!%p74_p9)
}
  0x17   :  { %38 = dma.vmem_to_hbm [thread:$0]  %s36_s12, 256, %s109_s1, [#allocation4]  }
  0x18   :  { %88 = dma.done.wait [#allocation4], 256  }
  0x19   :  { %89 = vsyncadd [#allocation4], 4294967040 }
  0x1a   :  { %42 = vsyncpa [#allocation3], 1 }
  0x1b   :  { %43 = vsyncpa [#allocation4], 1 }

</bundles_post_ra>
